<compile_context>
chip_gen: v6e
topology: v6e:2x2x1
jax: 0.10.0
libtpu: 0.0.40
codegen_flags: <defaults>
</compile_context>

<pallas_src>
import math
import functools

import numpy as np
import jax
import jax.numpy as jnp
from jax.experimental import pallas as pl
from jax.experimental.pallas import tpu as pltpu


# ---------------------------------------------------------------------------
# Fused kernel: grid = (batch, cout-tile).
# ---------------------------------------------------------------------------
def _extract_fused_kernel(coords_ref, x_ref, w1_ref, b1_ref, w2_ref, b2_ref,
                          o_ref, yp_ref, *, taps, lq):
    # coords_ref: (2, Lq) int32   row0 = stride*out_row, row1 = stride*out_col
    # x_ref     : (Cin, Ltot)     phase-plane input, lane-dense flat spatial
    # w1_ref    : (Cmid, Cin)     1x1 weights
    # b1_ref    : (Cmid, 1)  f32
    # w2_ref    : (9, CoutT, Cmid) 3x3 weights, tap-major (kh*3+kw)
    # b2_ref    : (CoutT, 1) f32
    # o_ref     : (CoutT, Lq)     lane-dense output (pitch Wc)
    # yp_ref    : (Cmid, Ltot)    VMEM scratch, persists across Cout tiles
    j = pl.program_id(1)

    # ---- stage 1: one channels-first matmul + ONE full-block store.
    #      Only computed on the first Cout tile of each batch element; the
    #      scratch is reused for the remaining Cout tiles (j axis is
    #      "arbitrary", so it iterates in order on one core). ----
    @pl.when(j == 0)
    def _():
        y = (jnp.dot(w1_ref[...], x_ref[...],
                     preferred_element_type=jnp.float32) + b1_ref[...])
        yp_ref[...] = y.astype(yp_ref.dtype)

    need_mask = any(m is not None for _, m in taps)
    if need_mask:
        sr = coords_ref[0:1, :]     # (1, Lq): stride * output row index
        sc = coords_ref[1:2, :]     # (1, Lq): stride * output col index

    cout_t = o_ref.shape[0]
    acc = jnp.zeros((cout_t, lq), jnp.float32)

    # ---- stage 2: 9 taps, each a contiguous static slice of the phase planes.
    for t, (base, mspec) in enumerate(taps):
        z = yp_ref[:, base:base + lq]                       # (Cmid, Lq), contiguous
        if mspec is not None:
            rlo, rhi, clo, chi = mspec
            m = None
            for cond in ((sr >= rlo) if rlo is not None else None,
                         (sr < rhi) if rhi is not None else None,
                         (sc >= clo) if clo is not None else None,
                         (sc < chi) if chi is not None else None):
                if cond is not None:
                    m = cond if m is None else (m & cond)
            z = jnp.where(m, z, 0)                          # kill border/pad lanes
        acc = acc + jnp.dot(w2_ref[t], z, preferred_element_type=jnp.float32)

    # ---- ONE lane-dense output store (gap columns stripped in the wrapper) ----
    o_ref[...] = (acc + b2_ref[...]).astype(o_ref.dtype)


# ---------------------------------------------------------------------------
# Wrapper: layout plumbing (pad + phase split of the input, tiny weight
# repacks) happens once in XLA; the kernel sees only lane-dense matmuls.
# ---------------------------------------------------------------------------
def extract_module_forward(x_nchw, params, *, stride=1, padding=0,
                           compute_dtype=jnp.bfloat16, cout_tile=None):
    w1, b1, w2, b2 = params   # (Cmid,Cin,1,1), (Cmid,), (Cout,Cmid,3,3), (Cout,)
    n, cin, h, w = x_nchw.shape
    cmid = w1.shape[0]
    cout = w2.shape[0]
    s = int(stride)
    pad = int(padding)

    hp, wp = h + 2 * pad, w + 2 * pad
    ho = (hp - 3) // s + 1
    wo = (wp - 3) // s + 1
    assert ho >= 1 and wo >= 1, "invalid output size"

    hc, wc = -(-hp // s), -(-wp // s)           # phase-plane dims (ceil(hp/s), ceil(wp/s))
    hp2, wp2 = hc * s, wc * s
    ltot = s * s * hc * wc                      # total lanes of the phase-plane layout
    lq = (ho - 1) * wc + wo                     # lane-dense output length at pitch wc

    # ---- input: pad + stride-phase de-interleave (pure XLA, done once).
    #      For stride=1/pad=0 this degenerates to a free reshape. ----
    xp = jnp.pad(x_nchw, ((0, 0), (0, 0),
                          (pad, pad + (hp2 - hp)),
                          (pad, pad + (wp2 - wp))))
    xp = xp.reshape(n, cin, hc, s, wc, s)
    xp = jnp.transpose(xp, (0, 1, 3, 5, 2, 4))          # (N, Cin, pr, pc, hc, wc)
    x_arr = xp.reshape(n, cin, ltot).astype(compute_dtype)

    # ---- weights / biases (bf16 MXU inputs, f32 biases) ----
    w1_mat = w1[:, :, 0, 0].astype(compute_dtype)                       # (Cmid, Cin)
    b1_col = b1.reshape(cmid, 1).astype(jnp.float32)
    w2_tap = (jnp.transpose(w2, (2, 3, 0, 1)).reshape(9, cout, cmid)
              .astype(compute_dtype))                                   # (9, Cout, Cmid)
    b2_col = b2.reshape(cout, 1).astype(jnp.float32)

    # ---- per-lane coords (stride*row, stride*col) for the boundary masks ----
    q = np.arange(lq, dtype=np.int64)
    coords = jnp.asarray(np.stack([(q // wc) * s, (q % wc) * s]).astype(np.int32))

    # ---- static tap table: base offset into the phase planes + mask spec ----
    taps = []
    for kh in range(3):
        for kw in range(3):
            base = (((kh % s) * s + (kw % s)) * (hc * wc)
                    + (kh // s) * wc + (kw // s))
            rlo = (pad - kh) if kh < pad else None
            rhi = (pad + h - kh) if (s * (ho - 1) + kh >= pad + h) else None
            clo = (pad - kw) if kw < pad else None
            chi = (pad + w - kw) if (s * (wo - 1) + kw >= pad + w) else None
            mspec = None if (rlo is None and rhi is None and clo is None
                             and chi is None) else (rlo, rhi, clo, chi)
            taps.append((base, mspec))
    taps = tuple(taps)

    # ---- Cout tiling (lengthens the grid; stage 1 is reused across tiles) ----
    if cout_tile is None:
        cout_tile = cout if (cout <= 256 or cout % 256 != 0) else 256
    assert cout % cout_tile == 0
    assert cout_tile == cout or cout_tile % 8 == 0
    j_tiles = cout // cout_tile

    # ---- VMEM budget (explicit limit; keeps double-buffering alive on v7x) ----
    esz = jnp.dtype(compute_dtype).itemsize
    vmem_est = (2 * cin * ltot * esz + 2 * 2 * lq * 4
                + 2 * cmid * cin * esz + 2 * cmid * 4
                + 2 * 9 * cout_tile * cmid * esz + 2 * cout_tile * 4
                + 2 * cout_tile * lq * 4
                + cmid * ltot * esz
                + cmid * ltot * 4 + cout_tile * lq * 4)
    vmem_limit = int(min(64 * 2 ** 20, max(32 * 2 ** 20, 2 * vmem_est)))

    cost = pl.CostEstimate(
        flops=int(2 * n * (cmid * cin * ltot + 9 * cout * cmid * lq)),
        transcendentals=0,
        bytes_accessed=int(n * cin * ltot * esz + 9 * cout * cmid * esz
                           + cmid * cin * esz + (cmid + cout) * 4
                           + 2 * lq * 4 + n * cout * lq * 4))

    kern = functools.partial(_extract_fused_kernel, taps=taps, lq=lq)

    out_flat = pl.pallas_call(
        kern,
        out_shape=jax.ShapeDtypeStruct((n, cout, lq), jnp.float32),
        grid=(n, j_tiles),
        in_specs=[
            pl.BlockSpec((2, lq), lambda b, j: (0, 0)),               # coords
            pl.BlockSpec((None, cin, ltot), lambda b, j: (b, 0, 0)),  # x (per batch)
            pl.BlockSpec((cmid, cin), lambda b, j: (0, 0)),           # w1
            pl.BlockSpec((cmid, 1), lambda b, j: (0, 0)),             # b1
            pl.BlockSpec((9, cout_tile, cmid), lambda b, j: (0, j, 0)),  # w2 taps
            pl.BlockSpec((cout_tile, 1), lambda b, j: (j, 0)),        # b2
        ],
        out_specs=pl.BlockSpec((None, cout_tile, lq), lambda b, j: (b, j, 0)),
        scratch_shapes=[pltpu.VMEM((cmid, ltot), compute_dtype)],
        compiler_params=pltpu.CompilerParams(
            dimension_semantics=("parallel", "arbitrary"),
            vmem_limit_bytes=vmem_limit),
        cost_estimate=cost,
    )(coords, x_arr, w1_mat, b1_col, w2_tap, b2_col)

    # Strip the (wc - wo) gap columns per row: pad tail, reshape, slice (cheap).
    out = jnp.pad(out_flat, ((0, 0), (0, 0), (0, ho * wc - lq)))
    return out.reshape(n, cout, ho, wc)[..., :wo]


# ---------------------------------------------------------------------------
# Deterministic PyTorch-style parameter init and a lax.conv reference.
# ---------------------------------------------------------------------------
def make_params(key, cin, cmid, cout):
    k1, k2, k3, k4 = jax.random.split(key, 4)
    b1bnd = 1.0 / math.sqrt(cin * 1 * 1)
    b2bnd = 1.0 / math.sqrt(cmid * 3 * 3)
    w1 = jax.random.uniform(k1, (cmid, cin, 1, 1), jnp.float32, -b1bnd, b1bnd)
    b1 = jax.random.uniform(k2, (cmid,), jnp.float32, -b1bnd, b1bnd)
    w2 = jax.random.uniform(k3, (cout, cmid, 3, 3), jnp.float32, -b2bnd, b2bnd)
    b2 = jax.random.uniform(k4, (cout,), jnp.float32, -b2bnd, b2bnd)
    return w1, b1, w2, b2


def reference_forward(x, params, *, stride, padding):
    w1, b1, w2, b2 = params
    dn = ("NCHW", "OIHW", "NCHW")
    y = jax.lax.conv_general_dilated(x, w1, (1, 1), "VALID", dimension_numbers=dn)
    y = y + b1.reshape(1, -1, 1, 1)
    z = jax.lax.conv_general_dilated(
        y, w2, (stride, stride), [(padding, padding), (padding, padding)],
        dimension_numbers=dn)
    return z + b2.reshape(1, -1, 1, 1)


if __name__ == "__main__":
    # Small shapes consistent with the module: N=2, Cin=4, Cmid=8, Cout=16, H=W=16.
    N, CIN, CMID, COUT, H, W = 2, 4, 8, 16, 16, 16

    key = jax.random.PRNGKey(0)
    xkey, pkey, p2key = jax.random.split(key, 3)
    x = jax.random.normal(xkey, (N, CIN, H, W), dtype=jnp.float32)
    params = make_params(pkey, CIN, CMID, COUT)

    # Exact (f32) checks — includes the previously-untested stride-2 path.
    for stride, pad in [(1, 1), (1, 0), (2, 1), (2, 0)]:
        out = extract_module_forward(x, params, stride=stride, padding=pad,
                                     compute_dtype=jnp.float32)
        out = jax.block_until_ready(out)
        ref = reference_forward(x, params, stride=stride, padding=pad)
        assert out.shape == ref.shape, (stride, pad, out.shape, ref.shape)
        assert jnp.allclose(out, ref, rtol=1e-5, atol=1e-5), \
            f"mismatch vs lax.conv reference (stride={stride}, pad={pad})"

    # Cout-tiled grid path (j_tiles > 1) — exercises stage-1 scratch reuse.
    params32 = make_params(p2key, CIN, CMID, 32)
    out = extract_module_forward(x, params32, stride=2, padding=1,
                                 compute_dtype=jnp.float32, cout_tile=8)
    out = jax.block_until_ready(out)
    ref = reference_forward(x, params32, stride=2, padding=1)
    assert out.shape == ref.shape
    assert jnp.allclose(out, ref, rtol=1e-5, atol=1e-5), "mismatch (cout tiling)"

    # bf16 MXU path (production default), loose tolerance vs f32 reference.
    for stride, pad in [(1, 1), (2, 1)]:
        out = extract_module_forward(x, params, stride=stride, padding=pad,
                                     compute_dtype=jnp.bfloat16)
        out = jax.block_until_ready(out)
        ref = reference_forward(x, params, stride=stride, padding=pad)
        assert jnp.allclose(out, ref, rtol=5e-2, atol=5e-2), \
            f"bf16 mismatch (stride={stride}, pad={pad})"

    print("KERNEL_OK")
</pallas_src>

<mosaic_0001>
module attributes {stable_mosaic.version = 11 : i64} {
  func.func @_extract_fused_kernel(%arg0: i32, %arg1: i32, %arg2: memref<2x286xi32, #tpu.memory_space<vmem>>, %arg3: memref<1x4x324xf32, #tpu.memory_space<vmem>>, %arg4: memref<8x4xf32, #tpu.memory_space<vmem>>, %arg5: memref<8x1xf32, #tpu.memory_space<vmem>>, %arg6: memref<9x16x8xf32, #tpu.memory_space<vmem>>, %arg7: memref<16x1xf32, #tpu.memory_space<vmem>>, %arg8: memref<1x16x286xf32, #tpu.memory_space<vmem>>, %arg9: memref<8x324xf32, #tpu.memory_space<vmem>>) attributes {dimension_semantics = [#tpu.dimension_semantics<parallel>, #tpu.dimension_semantics<arbitrary>], iteration_bounds = array<i64: 2, 1>, scalar_prefetch = 0 : i64, scratch_operands = 1 : i64, tpu.core_type = #tpu.core_type<tc>, window_params = [{pipeline_mode = #tpu.pipeline_mode<synchronous>, transform_indices = @transform_0, window_bounds = array<i64: 2, 286>}, {transform_indices = @transform_1, window_bounds = array<i64: 1, 4, 324>}, {pipeline_mode = #tpu.pipeline_mode<synchronous>, transform_indices = @transform_2, window_bounds = array<i64: 8, 4>}, {pipeline_mode = #tpu.pipeline_mode<synchronous>, transform_indices = @transform_3, window_bounds = array<i64: 8, 1>}, {transform_indices = @transform_4, window_bounds = array<i64: 9, 16, 8>}, {transform_indices = @transform_5, window_bounds = array<i64: 16, 1>}, {transform_indices = @transform_6, window_bounds = array<i64: 1, 16, 286>}]} {
    %c0_i32 = arith.constant 0 : i32
    %0 = arith.cmpi eq, %arg1, %c0_i32 : i32
    %1 = arith.extui %0 : i1 to i32
    %c0_i32_0 = arith.constant 0 : i32
    %2 = arith.cmpi ne, %1, %c0_i32_0 : i32
    scf.if %2 {
      %c0_67 = arith.constant 0 : index
      %c0_68 = arith.constant 0 : index
      %125 = vector.load %arg4[%c0_67, %c0_68] : memref<8x4xf32, #tpu.memory_space<vmem>>, vector<8x4xf32>
      %c0_69 = arith.constant 0 : index
      %c0_70 = arith.constant 0 : index
      %c0_71 = arith.constant 0 : index
      %126 = vector.load %arg3[%c0_69, %c0_70, %c0_71] : memref<1x4x324xf32, #tpu.memory_space<vmem>>, vector<1x4x324xf32>
      %127 = vector.shape_cast %126 : vector<1x4x324xf32> to vector<4x324xf32>
      %cst_72 = arith.constant dense<0.000000e+00> : vector<8x324xf32>
      %128 = tpu.matmul %125, %127, %cst_72 {dimension_numbers = #tpu.dot_dimension_numbers<[1], [0], [0], [1], [0, 0, 1, 1], [], []>} : vector<8x4xf32>, vector<4x324xf32>, vector<8x324xf32> -> vector<8x324xf32>
      %c0_73 = arith.constant 0 : index
      %c0_74 = arith.constant 0 : index
      %129 = vector.load %arg5[%c0_73, %c0_74] : memref<8x1xf32, #tpu.memory_space<vmem>>, vector<8x1xf32>
      %130 = vector.broadcast %129 : vector<8x1xf32> to vector<8x324xf32>
      %131 = arith.addf %128, %130 : vector<8x324xf32>
      %c0_75 = arith.constant 0 : index
      %c0_76 = arith.constant 0 : index
      %132 = vector.load %arg9[%c0_75, %c0_76] : memref<8x324xf32, #tpu.memory_space<vmem>>, vector<8x324xf32>
      tpu.vector_store %arg9[%c0_75, %c0_76], %131 {strides = array<i32>} : memref<8x324xf32, #tpu.memory_space<vmem>>, vector<8x324xf32>,
    } else {
    }
    %c0 = arith.constant 0 : index
    %c0_1 = arith.constant 0 : index
    %3 = vector.load %arg2[%c0, %c0_1] : memref<2x286xi32, #tpu.memory_space<vmem>>, vector<1x286xi32>
    %c1 = arith.constant 1 : index
    %c0_2 = arith.constant 0 : index
    %4 = vector.load %arg2[%c1, %c0_2] : memref<2x286xi32, #tpu.memory_space<vmem>>, vector<1x286xi32>
    %cst = arith.constant 0.000000e+00 : f32
    %5 = vector.broadcast %cst : f32 to vector<16x286xf32>
    %c0_3 = arith.constant 0 : index
    %c0_4 = arith.constant 0 : index
    %6 = vector.load %arg9[%c0_3, %c0_4] : memref<8x324xf32, #tpu.memory_space<vmem>>, vector<8x286xf32>
    %c1_i32 = arith.constant 1 : i32
    %7 = vector.broadcast %c1_i32 : i32 to vector<1x286xi32>
    %8 = arith.cmpi sge, %3, %7 : vector<1x286xi32>
    %c1_i32_5 = arith.constant 1 : i32
    %9 = vector.broadcast %c1_i32_5 : i32 to vector<1x286xi32>
    %10 = arith.cmpi sge, %4, %9 : vector<1x286xi32>
    %11 = arith.andi %8, %10 : vector<1x286xi1>
    %c0_i32_6 = arith.constant 0 : i32
    %12 = arith.sitofp %c0_i32_6 : i32 to f32
    %13 = vector.shape_cast %11 : vector<1x286xi1> to vector<1x286xi1>
    %14 = vector.broadcast %13 : vector<1x286xi1> to vector<8x286xi1>
    %15 = vector.broadcast %12 : f32 to vector<8x286xf32>
    %16 = arith.select %14, %6, %15 : vector<8x286xi1>, vector<8x286xf32>
    %c0_7 = arith.constant 0 : index
    %c0_8 = arith.constant 0 : index
    %c0_9 = arith.constant 0 : index
    %17 = vector.load %arg6[%c0_7, %c0_8, %c0_9] : memref<9x16x8xf32, #tpu.memory_space<vmem>>, vector<1x16x8xf32>
    %18 = vector.shape_cast %17 : vector<1x16x8xf32> to vector<16x8xf32>
    %cst_10 = arith.constant dense<0.000000e+00> : vector<16x286xf32>
    %19 = tpu.matmul %18, %16, %cst_10 {dimension_numbers = #tpu.dot_dimension_numbers<[1], [0], [0], [1], [0, 0, 1, 1], [], []>} : vector<16x8xf32>, vector<8x286xf32>, vector<16x286xf32> -> vector<16x286xf32>
    %20 = arith.addf %5, %19 : vector<16x286xf32>
    %c0_11 = arith.constant 0 : index
    %c1_12 = arith.constant 1 : index
    %21 = vector.load %arg9[%c0_11, %c1_12] : memref<8x324xf32, #tpu.memory_space<vmem>>, vector<8x286xf32>
    %c1_i32_13 = arith.constant 1 : i32
    %22 = vector.broadcast %c1_i32_13 : i32 to vector<1x286xi32>
    %23 = arith.cmpi sge, %3, %22 : vector<1x286xi32>
    %c0_i32_14 = arith.constant 0 : i32
    %24 = arith.sitofp %c0_i32_14 : i32 to f32
    %25 = vector.shape_cast %23 : vector<1x286xi1> to vector<1x286xi1>
    %26 = vector.broadcast %25 : vector<1x286xi1> to vector<8x286xi1>
    %27 = vector.broadcast %24 : f32 to vector<8x286xf32>
    %28 = arith.select %26, %21, %27 : vector<8x286xi1>, vector<8x286xf32>
    %c1_15 = arith.constant 1 : index
    %c0_16 = arith.constant 0 : index
    %c0_17 = arith.constant 0 : index
    %29 = vector.load %arg6[%c1_15, %c0_16, %c0_17] : memref<9x16x8xf32, #tpu.memory_space<vmem>>, vector<1x16x8xf32>
    %30 = vector.shape_cast %29 : vector<1x16x8xf32> to vector<16x8xf32>
    %cst_18 = arith.constant dense<0.000000e+00> : vector<16x286xf32>
    %31 = tpu.matmul %30, %28, %cst_18 {dimension_numbers = #tpu.dot_dimension_numbers<[1], [0], [0], [1], [0, 0, 1, 1], [], []>} : vector<16x8xf32>, vector<8x286xf32>, vector<16x286xf32> -> vector<16x286xf32>
    %32 = arith.addf %20, %31 : vector<16x286xf32>
    %c0_19 = arith.constant 0 : index
    %c2 = arith.constant 2 : index
    %33 = vector.load %arg9[%c0_19, %c2] : memref<8x324xf32, #tpu.memory_space<vmem>>, vector<8x286xf32>
    %c1_i32_20 = arith.constant 1 : i32
    %34 = vector.broadcast %c1_i32_20 : i32 to vector<1x286xi32>
    %35 = arith.cmpi sge, %3, %34 : vector<1x286xi32>
    %c15_i32 = arith.constant 15 : i32
    %36 = vector.broadcast %c15_i32 : i32 to vector<1x286xi32>
    %37 = arith.cmpi slt, %4, %36 : vector<1x286xi32>
    %38 = arith.andi %35, %37 : vector<1x286xi1>
    %c0_i32_21 = arith.constant 0 : i32
    %39 = arith.sitofp %c0_i32_21 : i32 to f32
    %40 = vector.shape_cast %38 : vector<1x286xi1> to vector<1x286xi1>
    %41 = vector.broadcast %40 : vector<1x286xi1> to vector<8x286xi1>
    %42 = vector.broadcast %39 : f32 to vector<8x286xf32>
    %43 = arith.select %41, %33, %42 : vector<8x286xi1>, vector<8x286xf32>
    %c2_22 = arith.constant 2 : index
    %c0_23 = arith.constant 0 : index
    %c0_24 = arith.constant 0 : index
    %44 = vector.load %arg6[%c2_22, %c0_23, %c0_24] : memref<9x16x8xf32, #tpu.memory_space<vmem>>, vector<1x16x8xf32>
    %45 = vector.shape_cast %44 : vector<1x16x8xf32> to vector<16x8xf32>
    %cst_25 = arith.constant dense<0.000000e+00> : vector<16x286xf32>
    %46 = tpu.matmul %45, %43, %cst_25 {dimension_numbers = #tpu.dot_dimension_numbers<[1], [0], [0], [1], [0, 0, 1, 1], [], []>} : vector<16x8xf32>, vector<8x286xf32>, vector<16x286xf32> -> vector<16x286xf32>
    %47 = arith.addf %32, %46 : vector<16x286xf32>
    %c0_26 = arith.constant 0 : index
    %c18 = arith.constant 18 : index
    %48 = vector.load %arg9[%c0_26, %c18] : memref<8x324xf32, #tpu.memory_space<vmem>>, vector<8x286xf32>
    %c1_i32_27 = arith.constant 1 : i32
    %49 = vector.broadcast %c1_i32_27 : i32 to vector<1x286xi32>
    %50 = arith.cmpi sge, %4, %49 : vector<1x286xi32>
    %c0_i32_28 = arith.constant 0 : i32
    %51 = arith.sitofp %c0_i32_28 : i32 to f32
    %52 = vector.shape_cast %50 : vector<1x286xi1> to vector<1x286xi1>
    %53 = vector.broadcast %52 : vector<1x286xi1> to vector<8x286xi1>
    %54 = vector.broadcast %51 : f32 to vector<8x286xf32>
    %55 = arith.select %53, %48, %54 : vector<8x286xi1>, vector<8x286xf32>
    %c3 = arith.constant 3 : index
    %c0_29 = arith.constant 0 : index
    %c0_30 = arith.constant 0 : index
    %56 = vector.load %arg6[%c3, %c0_29, %c0_30] : memref<9x16x8xf32, #tpu.memory_space<vmem>>, vector<1x16x8xf32>
    %57 = vector.shape_cast %56 : vector<1x16x8xf32> to vector<16x8xf32>
    %cst_31 = arith.constant dense<0.000000e+00> : vector<16x286xf32>
    %58 = tpu.matmul %57, %55, %cst_31 {dimension_numbers = #tpu.dot_dimension_numbers<[1], [0], [0], [1], [0, 0, 1, 1], [], []>} : vector<16x8xf32>, vector<8x286xf32>, vector<16x286xf32> -> vector<16x286xf32>
    %59 = arith.addf %47, %58 : vector<16x286xf32>
    %c0_32 = arith.constant 0 : index
    %c19 = arith.constant 19 : index
    %60 = vector.load %arg9[%c0_32, %c19] : memref<8x324xf32, #tpu.memory_space<vmem>>, vector<8x286xf32>
    %c4 = arith.constant 4 : index
    %c0_33 = arith.constant 0 : index
    %c0_34 = arith.constant 0 : index
    %61 = vector.load %arg6[%c4, %c0_33, %c0_34] : memref<9x16x8xf32, #tpu.memory_space<vmem>>, vector<1x16x8xf32>
    %62 = vector.shape_cast %61 : vector<1x16x8xf32> to vector<16x8xf32>
    %cst_35 = arith.constant dense<0.000000e+00> : vector<16x286xf32>
    %63 = tpu.matmul %62, %60, %cst_35 {dimension_numbers = #tpu.dot_dimension_numbers<[1], [0], [0], [1], [0, 0, 1, 1], [], []>} : vector<16x8xf32>, vector<8x286xf32>, vector<16x286xf32> -> vector<16x286xf32>
    %64 = arith.addf %59, %63 : vector<16x286xf32>
    %c0_36 = arith.constant 0 : index
    %c20 = arith.constant 20 : index
    %65 = vector.load %arg9[%c0_36, %c20] : memref<8x324xf32, #tpu.memory_space<vmem>>, vector<8x286xf32>
    %c15_i32_37 = arith.constant 15 : i32
    %66 = vector.broadcast %c15_i32_37 : i32 to vector<1x286xi32>
    %67 = arith.cmpi slt, %4, %66 : vector<1x286xi32>
    %c0_i32_38 = arith.constant 0 : i32
    %68 = arith.sitofp %c0_i32_38 : i32 to f32
    %69 = vector.shape_cast %67 : vector<1x286xi1> to vector<1x286xi1>
    %70 = vector.broadcast %69 : vector<1x286xi1> to vector<8x286xi1>
    %71 = vector.broadcast %68 : f32 to vector<8x286xf32>
    %72 = arith.select %70, %65, %71 : vector<8x286xi1>, vector<8x286xf32>
    %c5 = arith.constant 5 : index
    %c0_39 = arith.constant 0 : index
    %c0_40 = arith.constant 0 : index
    %73 = vector.load %arg6[%c5, %c0_39, %c0_40] : memref<9x16x8xf32, #tpu.memory_space<vmem>>, vector<1x16x8xf32>
    %74 = vector.shape_cast %73 : vector<1x16x8xf32> to vector<16x8xf32>
    %cst_41 = arith.constant dense<0.000000e+00> : vector<16x286xf32>
    %75 = tpu.matmul %74, %72, %cst_41 {dimension_numbers = #tpu.dot_dimension_numbers<[1], [0], [0], [1], [0, 0, 1, 1], [], []>} : vector<16x8xf32>, vector<8x286xf32>, vector<16x286xf32> -> vector<16x286xf32>
    %76 = arith.addf %64, %75 : vector<16x286xf32>
    %c0_42 = arith.constant 0 : index
    %c36 = arith.constant 36 : index
    %77 = vector.load %arg9[%c0_42, %c36] : memref<8x324xf32, #tpu.memory_space<vmem>>, vector<8x286xf32>
    %c15_i32_43 = arith.constant 15 : i32
    %78 = vector.broadcast %c15_i32_43 : i32 to vector<1x286xi32>
    %79 = arith.cmpi slt, %3, %78 : vector<1x286xi32>
    %c1_i32_44 = arith.constant 1 : i32
    %80 = vector.broadcast %c1_i32_44 : i32 to vector<1x286xi32>
    %81 = arith.cmpi sge, %4, %80 : vector<1x286xi32>
    %82 = arith.andi %79, %81 : vector<1x286xi1>
    %c0_i32_45 = arith.constant 0 : i32
    %83 = arith.sitofp %c0_i32_45 : i32 to f32
    %84 = vector.shape_cast %82 : vector<1x286xi1> to vector<1x286xi1>
    %85 = vector.broadcast %84 : vector<1x286xi1> to vector<8x286xi1>
    %86 = vector.broadcast %83 : f32 to vector<8x286xf32>
    %87 = arith.select %85, %77, %86 : vector<8x286xi1>, vector<8x286xf32>
    %c6 = arith.constant 6 : index
    %c0_46 = arith.constant 0 : index
    %c0_47 = arith.constant 0 : index
    %88 = vector.load %arg6[%c6, %c0_46, %c0_47] : memref<9x16x8xf32, #tpu.memory_space<vmem>>, vector<1x16x8xf32>
    %89 = vector.shape_cast %88 : vector<1x16x8xf32> to vector<16x8xf32>
    %cst_48 = arith.constant dense<0.000000e+00> : vector<16x286xf32>
    %90 = tpu.matmul %89, %87, %cst_48 {dimension_numbers = #tpu.dot_dimension_numbers<[1], [0], [0], [1], [0, 0, 1, 1], [], []>} : vector<16x8xf32>, vector<8x286xf32>, vector<16x286xf32> -> vector<16x286xf32>
    %91 = arith.addf %76, %90 : vector<16x286xf32>
    %c0_49 = arith.constant 0 : index
    %c37 = arith.constant 37 : index
    %92 = vector.load %arg9[%c0_49, %c37] : memref<8x324xf32, #tpu.memory_space<vmem>>, vector<8x286xf32>
    %c15_i32_50 = arith.constant 15 : i32
    %93 = vector.broadcast %c15_i32_50 : i32 to vector<1x286xi32>
    %94 = arith.cmpi slt, %3, %93 : vector<1x286xi32>
    %c0_i32_51 = arith.constant 0 : i32
    %95 = arith.sitofp %c0_i32_51 : i32 to f32
    %96 = vector.shape_cast %94 : vector<1x286xi1> to vector<1x286xi1>
    %97 = vector.broadcast %96 : vector<1x286xi1> to vector<8x286xi1>
    %98 = vector.broadcast %95 : f32 to vector<8x286xf32>
    %99 = arith.select %97, %92, %98 : vector<8x286xi1>, vector<8x286xf32>
    %c7 = arith.constant 7 : index
    %c0_52 = arith.constant 0 : index
    %c0_53 = arith.constant 0 : index
    %100 = vector.load %arg6[%c7, %c0_52, %c0_53] : memref<9x16x8xf32, #tpu.memory_space<vmem>>, vector<1x16x8xf32>
    %101 = vector.shape_cast %100 : vector<1x16x8xf32> to vector<16x8xf32>
    %cst_54 = arith.constant dense<0.000000e+00> : vector<16x286xf32>
    %102 = tpu.matmul %101, %99, %cst_54 {dimension_numbers = #tpu.dot_dimension_numbers<[1], [0], [0], [1], [0, 0, 1, 1], [], []>} : vector<16x8xf32>, vector<8x286xf32>, vector<16x286xf32> -> vector<16x286xf32>
    %103 = arith.addf %91, %102 : vector<16x286xf32>
    %c0_55 = arith.constant 0 : index
    %c38 = arith.constant 38 : index
    %104 = vector.load %arg9[%c0_55, %c38] : memref<8x324xf32, #tpu.memory_space<vmem>>, vector<8x286xf32>
    %c15_i32_56 = arith.constant 15 : i32
    %105 = vector.broadcast %c15_i32_56 : i32 to vector<1x286xi32>
    %106 = arith.cmpi slt, %3, %105 : vector<1x286xi32>
    %c15_i32_57 = arith.constant 15 : i32
    %107 = vector.broadcast %c15_i32_57 : i32 to vector<1x286xi32>
    %108 = arith.cmpi slt, %4, %107 : vector<1x286xi32>
    %109 = arith.andi %106, %108 : vector<1x286xi1>
    %c0_i32_58 = arith.constant 0 : i32
    %110 = arith.sitofp %c0_i32_58 : i32 to f32
    %111 = vector.shape_cast %109 : vector<1x286xi1> to vector<1x286xi1>
    %112 = vector.broadcast %111 : vector<1x286xi1> to vector<8x286xi1>
    %113 = vector.broadcast %110 : f32 to vector<8x286xf32>
    %114 = arith.select %112, %104, %113 : vector<8x286xi1>, vector<8x286xf32>
    %c8 = arith.constant 8 : index
    %c0_59 = arith.constant 0 : index
    %c0_60 = arith.constant 0 : index
    %115 = vector.load %arg6[%c8, %c0_59, %c0_60] : memref<9x16x8xf32, #tpu.memory_space<vmem>>, vector<1x16x8xf32>
    %116 = vector.shape_cast %115 : vector<1x16x8xf32> to vector<16x8xf32>
    %cst_61 = arith.constant dense<0.000000e+00> : vector<16x286xf32>
    %117 = tpu.matmul %116, %114, %cst_61 {dimension_numbers = #tpu.dot_dimension_numbers<[1], [0], [0], [1], [0, 0, 1, 1], [], []>} : vector<16x8xf32>, vector<8x286xf32>, vector<16x286xf32> -> vector<16x286xf32>
    %118 = arith.addf %103, %117 : vector<16x286xf32>
    %c0_62 = arith.constant 0 : index
    %c0_63 = arith.constant 0 : index
    %119 = vector.load %arg7[%c0_62, %c0_63] : memref<16x1xf32, #tpu.memory_space<vmem>>, vector<16x1xf32>
    %120 = vector.broadcast %119 : vector<16x1xf32> to vector<16x286xf32>
    %121 = arith.addf %118, %120 : vector<16x286xf32>
    %c0_64 = arith.constant 0 : index
    %c0_65 = arith.constant 0 : index
    %c0_66 = arith.constant 0 : index
    %122 = vector.load %arg8[%c0_64, %c0_65, %c0_66] : memref<1x16x286xf32, #tpu.memory_space<vmem>>, vector<1x16x286xf32>
    %123 = vector.shape_cast %122 : vector<1x16x286xf32> to vector<16x286xf32>
    %124 = vector.shape_cast %121 : vector<16x286xf32> to vector<1x16x286xf32>
    tpu.vector_store %arg8[%c0_64, %c0_65, %c0_66], %124 {strides = array<i32>} : memref<1x16x286xf32, #tpu.memory_space<vmem>>, vector<1x16x286xf32>,
    return
  }
  func.func @transform_0(%arg0: i32, %arg1: i32) -> (i32, i32) {
    %c0_i32 = arith.constant 0 : i32
    %c0_i32_0 = arith.constant 0 : i32
    %c0_i32_1 = arith.constant 0 : i32
    return %c0_i32, %c0_i32_0 : i32, i32
  }
  func.func @transform_1(%arg0: i32, %arg1: i32) -> (i32, i32, i32) {
    %c0_i32 = arith.constant 0 : i32
    %c0_i32_0 = arith.constant 0 : i32
    %c0_i32_1 = arith.constant 0 : i32
    return %arg0, %c0_i32, %c0_i32_0 : i32, i32, i32
  }
  func.func @transform_2(%arg0: i32, %arg1: i32) -> (i32, i32) {
    %c0_i32 = arith.constant 0 : i32
    %c0_i32_0 = arith.constant 0 : i32
    %c0_i32_1 = arith.constant 0 : i32
    return %c0_i32, %c0_i32_0 : i32, i32
  }
  func.func @transform_3(%arg0: i32, %arg1: i32) -> (i32, i32) {
    %c0_i32 = arith.constant 0 : i32
    %c0_i32_0 = arith.constant 0 : i32
    %c0_i32_1 = arith.constant 0 : i32
    return %c0_i32, %c0_i32_0 : i32, i32
  }
  func.func @transform_4(%arg0: i32, %arg1: i32) -> (i32, i32, i32) {
    %c0_i32 = arith.constant 0 : i32
    %c0_i32_0 = arith.constant 0 : i32
    %c0_i32_1 = arith.constant 0 : i32
    return %c0_i32, %arg1, %c0_i32_0 : i32, i32, i32
  }
  func.func @transform_5(%arg0: i32, %arg1: i32) -> (i32, i32) {
    %c0_i32 = arith.constant 0 : i32
    %c0_i32_0 = arith.constant 0 : i32
    return %arg1, %c0_i32 : i32, i32
  }
  func.func @transform_6(%arg0: i32, %arg1: i32) -> (i32, i32, i32) {
    %c0_i32 = arith.constant 0 : i32
    %c0_i32_0 = arith.constant 0 : i32
    return %arg0, %arg1, %c0_i32 : i32, i32, i32
  }
}

</mosaic_0001>

<bundles_post_ra>
// kernel: tpu_custom_call.1
= control target key start
LH: loop header
LB: loop body
LE: loop exit
PB: predicated region body
PF: predicated region fallthrough
CT: control target
= control target key end

     0   :  { %11 = vsyncpa [#allocation4], 0  ;;  %s3150_s0 = inlined_call_operand.vmem [shape: s32[2,286], index: 0, kind: input, shape index: {}]   ;;  %s3151_s1 = inlined_call_operand.vmem [shape: f32[2,4,324], index: 1, kind: input, shape index: {}]   ;;  %s3152_s2 = inlined_call_operand.vmem [shape: f32[8,4], index: 2, kind: input, shape index: {}]   ;;  %s3153_s3 = inlined_call_operand.vmem [shape: f32[8,1], index: 3, kind: input, shape index: {}]   ;;  %s3154_s4 = inlined_call_operand.vmem [shape: f32[9,16,8], index: 4, kind: input, shape index: {}]   ;;  %s3155_s5 = inlined_call_operand.vmem [shape: f32[16,1], index: 5, kind: input, shape index: {}]   ;;  %s3156_s6 = inlined_call_operand.hbm [shape: f32[2,16,286], index: 6, kind: output, shape index: {}]  }
   0x1   :  { %13 = vsyncpa [#allocation4 + $0x1], 0  ;;  %s2755_s21 = smov 0   ;;  %s2757_s22 = smov 0  }
   0x2   :  { %s2759_s23 = smov 0   ;;  %s2761_s24 = smov 0  }
   0x3   :  { %s2763_s25 = smov 0   ;;  %s2765_s26 = smov 0  }
   0x4 LB: > { %s2382_s27 = sadd.s32 4294967295, %s2704_s26   ;;  %s2383_s28 = sadd.s32 4294967294, %s2704_s26   ;;  %s2704_s26 = sphi %s2765_s26, %s19_s26   ;;  %s2700_s25 = sphi %s2763_s25, %s3171_s25   ;;  %s2696_s24 = sphi %s2761_s24, %s3170_s24   ;;  %s2692_s23 = sphi %s2759_s23, %s3169_s23   ;;  %s2688_s22 = sphi %s2757_s22, %s3168_s22   ;;  %s2684_s21 = sphi %s2755_s21, %s3167_s21  }
   0x5   : > { %s31_s29 = sadd.s32 1, %s2700_s25  ;;  %s181_s30 = sadd.s32 1, %s2692_s23 }
   0x6   : > { %p33_p0 = scmp.ge.s32.totalorder %s31_s29, 2  ;;  %p191_p1 = scmp.ne.s32.totalorder %s2692_s23, %s2688_s22 }
   0x7   : > { %p192_p2 = scmp.eq.s32.totalorder %s2382_s27, 1  ;;  %p197_p3 = scmp.ne.s32.totalorder %s2688_s22, %s2684_s21 }
   0x8   : > { %s3173_s29 = smov (%p33_p0, %s31_s29), 0  ;;  %p198_p5 = scmp.eq.s32.totalorder %s2383_s28, 1 }
   0x9   : > { %p2795_p4 = por %p192_p2, %p191_p1  ;;  %s176_s8 = ssub.s32 %s2700_s25, %s3173_s29 }
   0xa   : > { %p2388_p6 = scmp.ge.s32.totalorder %s2704_s26, 1  ;;  %p179_p7 = scmp.eq.s32.totalorder %s176_s8, 0 }
   0xb   : > { %p2802_p8 = por %p198_p5, %p197_p3  ;;  %p251_p9 = scmp.lt.s32.totalorder %s2704_s26, 3 }
   0xc   : > { %s2808_s10 = scalar_select %p179_p7, %s2692_s23, %s181_s30  }
   0xd   : > { %p252_p10 = pnand %p2388_p6, %p251_p9 }
   0xe   : > { %p291_p11 = scmp.lt.s32.totalorder (!%p252_p10), %s2696_s24, 1  ;;  %s2709_s28 = smov (!%p252_p10), 127  }
   0xf   : > { %255 = sbr.rel (%p252_p10) target bundleno = 616 (0x268), region = 44  ;;  %s2710_s30 = smov (!%p252_p10), 126  }
  0x10   : > { %s2711_s8 = smov (!%p252_p10), 110   ;;  %s2712_s11 = smov (!%p252_p10), 109  }
  0x11   : > { %s2713_s12 = smov (!%p252_p10), 108   ;;  %s2716_s15 = smov (!%p252_p10), 90  }
  0x12   : > { %s288_s16 = sand.u32 (!%p252_p10), 1, %s2688_s22   ;;  %s2556_s19 = smul.u32 (!%p252_p10), 768, %s2696_s24 }
  0x14   : > { %v2706_v0 = vmov 0.0   ;;  %vm2707_vm0 = vmmov 0   ;;  %v316_v1 = vld [vmem:[%s3153_s3] sm:$0xff]  ;;  %s292_s13 = scalar_select %p291_p11, %s2696_s24, 1  ;;  %v2708_v2 = vmov 0   ;;  %vm329_vm1 = vcmask 1043456  }
  0x15   : > { %2504 = vmatprep.subr.mxu1 %v2706_v0  ;;  %2506 = vmatprep.mubr.msk.f32.mxu1 %vm2707_vm0, %v2706_v0  ;;  %v313_v3 = vld [vmem:[%s3152_s2] sm:$0xff]  ;;  %vm325_vm2 = vcmask 31744   ;;  %v2830_v8 = vld [vmem:[%s3154_s4 + $0x10] sm:$0xff]  ;;  %vm548_vm3 = vcmask 64512   ;;  %vm479_vm4 = vcmask 556032   ;;  %v2238_v17 = vld [vmem:[%s3155_s5 + $0x8] sm:$0xff]  ;;  %v491_v19 = vlaneseq }
  0x16   : > { %400 = vmatprep.mubr.f32.mxu0 %v2706_v0  ;;  %2625 = vset.pattern.permute.xlu0 %v2708_v2  ;;  %s2555_s14 = smul.u32 12, %s292_s13  ;;  %s2714_s13 = smov 92   ;;  %v2237_v18 = vld [vmem:[%s3155_s5] sm:$0xff]  ;;  %vm536_vm11 = vcmask 1039360   ;;  %v2397_v36 = vld [vmem:[%s3154_s4 + $0x18] sm:$0xff]  ;;  %v510_v49 = vld [vmem:[%s3154_s4 + $0x8] sm:$0xff] }
  0x17   : > { %319 = vperm.xlu0 %2625, %v316_v1   ;;  %2626 = vset.pattern.permute.xlu1 %v2708_v2  ;;  %v2873_v20 = vld [vmem:[%s3150_s0] ss:$2 sm:$0x7]  ;;  %v2878_v21 = vld [vmem:[%s3150_s0 + $0x1] ss:$2 sm:$0x7] }
  0x18   : > { %s295_s17 = scalar_lea.vmem %s3151_s1, %s2555_s14  ;;  %s2715_s14 = smov 91   ;;  %v492_v22 = vshrl.u32 %v491_v19, 7  ;;  %vm487_vm5 = vcmp.ge.s32.totalorder %v2873_v20, 1  ;;  %vm488_vm6 = vcmp.ge.s32.totalorder %v2878_v21, 1  ;;  %vm865_vm8 = vcmp.lt.s32.totalorder %v2878_v21, 15  ;;  %v509_v44 = vld [vmem:[%s3154_s4] sm:$0xff] }
  0x19   : > { %v315_v4 = vld [vmem:[%s295_s17 + $0x8] sm:$0xf]  ;;  %v314_v5 = vld [vmem:[%s295_s17] sm:$0xff]  ;;  %vm489_vm7 = vmand %vm487_vm5, %vm488_vm6  ;;  %v511_v24 = vsel %vm487_vm5, 1, %v2708_v2  ;;  %v1065_v46 = vsel %vm488_vm6, 1, %v2708_v2  ;;  %s2554_s17 = smul.u32 48, %s288_s16 }
  0x1a   : > { %2505 = vmatpush3.msk.msra.mxu1 %vm329_vm1, %v315_v4  ;;  %v324_v6 = vcombine.high %v314_v5, %v314_v5  ;;  %v2882_v23 = vsub.s32 2, %v492_v22  ;;  %v2887_v25 = vsub.s32 1, %v492_v22  ;;  %v490_v26 = vsel %vm489_vm7, 1, %v2708_v2  ;;  %vm866_vm9 = vmand %vm487_vm5, %vm865_vm8  ;;  %v2412_v52 = vld [vmem:[%s3154_s4 + $0x20] sm:$0xff]  ;;  %v2413_v57 = vld [vmem:[%s3154_s4 + $0x28] sm:$0xff]  ;;  %s3105_s24 = scalar_lea.sflag [#allocation4], %s288_s16 }
  0x1b   : > { %2507 = vmatmul.mubr.msk.f32.vlgmr.msra.gmra.mxu1 %vm325_vm2, %v313_v3  ;;  %v2890_v27 = vsub.s32 0, %v492_v22  ;;  %v867_v34 = vsel %vm866_vm9, 1, %v2708_v2  ;;  %vm1087_vm7 = vcmask 900096   ;;  %v2421_v1 = vld [vmem:[%s3154_s4 + $0x30] sm:$0xff]  ;;  %v1442_v4 = vsel %vm865_vm8, 1, %v2708_v2  ;;  %s290_s18 = scalar_lea.vmem [#allocation3], %s2554_s17 }
  0x1c   : > { %2390 = vmatprep.subr.msk.mxu0 %vm329_vm1, %v324_v6  ;;  %2511 = vmatprep.mubr.msk.f32.mxu1 %vm548_vm3, %v2830_v8  ;;  %v523_v28 = vrot.slane %v511_v24, %v2882_v23  ;;  %v519_v29 = vrot.slane %v511_v24, %v2887_v25  ;;  %v498_v30 = vrot.slane %v490_v26, %v2887_v25  ;;  %s2279_s20 = sshll.u32 %s290_s18, 4  ;;  %s3101_s20 = int_to_ptr.vmem [resolvable:$true] %s2279_s20 }
  0x1d   : > { %2391 = vmatpush1.msk.msra.mxu0 %vm329_vm1, %v314_v5  ;;  %v494_v31 = vrot.slane %v490_v26, %v2890_v27  ;;  %v515_v33 = vrot.slane %v511_v24, %v2890_v27  ;;  %v502_v37 = vrot.slane %v490_v26, %v2882_v23  ;;  %v879_v40 = vrot.slane %v867_v34, %v2882_v23 }
  0x1e   : > { %2392 = vmatmul.mubr.msk.f32.vlgmr.msra.gmra.mxu0 %vm325_vm2, %v313_v3  ;;  %vm526_vm10 = vcmp.eq.s32.totalorder %v523_v28, 1  ;;  %vm525_vm12 = vcmp.eq.s32.totalorder %v519_v29, 1  ;;  %vm504_vm13 = vcmp.eq.s32.totalorder %v498_v30, 1  ;;  %v875_v41 = vrot.slane %v867_v34, %v2887_v25  ;;  %v2436_v29 = vld [vmem:[%s3154_s4 + $0x50] sm:$0xff] }
  0x1f   : > { %619 = vmatprep.mubr.f32.mxu0 %v2706_v0  ;;  %vm503_vm14 = vcmp.eq.s32.totalorder %v494_v31, 1  ;;  %vm524_vm15 = vcmp.eq.s32.totalorder %v515_v33, 1  ;;  %vm505_vm0 = vcmp.eq.s32.totalorder %v502_v37, 1  ;;  %vm882_vm1 = vcmp.eq.s32.totalorder %v879_v40, 1 }
  0x20   : > { %vm881_vm2 = vcmp.eq.s32.totalorder %v875_v41, 1  ;;  %v871_v51 = vrot.slane %v867_v34, %v2890_v27  ;;  %v1077_v53 = vrot.slane %v1065_v46, %v2882_v23  ;;  %v1073_v54 = vrot.slane %v1065_v46, %v2887_v25 }
  0x21   : > { %v1069_v56 = vrot.slane %v1065_v46, %v2890_v27 }
  0x22   : > { %vm880_vm5 = vcmp.eq.s32.totalorder %v871_v51, 1  ;;  %vm2944_vm9 = vcmp.eq.s32.totalorder %v1077_v53, 1  ;;  %v2455_v51 = vld [vmem:[%s3154_s4 + $0x78] sm:$0xff]  ;;  %v2463_v53 = vld [vmem:[%s3154_s4 + $0x80] sm:$0xff] }
  0x92   : > { %v320_v7 = vpop.permute.xlu0 %319 }
  0xdb   : > { %v473_v9 = vpop.f32.mrf.mxu1 }
  0xdc   : > { %v474_v10 = vadd.f32 %v473_v9, %v320_v7  ;;  %v2430_v9 = vld [vmem:[%s3154_s4 + $0x40] sm:$0xff] }
  0xdd   : > { %v2508_v11 = vpop.f32.mrf.mxu1 }
  0xde   : > { %480 = vst.msk [vmem:[#allocation2 + $0x10] sm:$0xff] %vm479_vm4, %v474_v10  ;;  %v402_v12 = vpop.f32.mrf.mxu0  ;;  %vm889_vm4 = vcmask 1031168   ;;  %v1454_v10 = vrot.slane %v1442_v4, %v2882_v23  ;;  %v1450_v11 = vrot.slane %v1442_v4, %v2887_v25 }
  0xdf   : > { %v2834_v13 = vadd.f32 %v402_v12, %v320_v7 }
  0xe0   : > { %v404_v14 = vpop.f32.mrf.mxu0 }
  0xe1   : > { %v2836_v15 = vadd.f32 %v404_v14, %v320_v7  ;;  %v2422_v7 = vld [vmem:[%s3154_s4 + $0x38] sm:$0xff]  ;;  %v1446_v14 = vrot.slane %v1442_v4, %v2890_v27 }
  0xe3   : > { %532 = vrot.lane.b32.xlu0 %v2836_v15, %s2709_s28 }
  0xe5   : > { %v2839_v16 = vld [vmem:[#allocation2 + $0x10] sm:$0xff] }
  0xe6   : > { %534 = vrot.lane.b32.xlu1 %v2839_v16, %s2709_s28 }
  0xe7   : > { %885 = vrot.lane.b32.xlu0 %v2836_v15, %s2710_s30 }
  0xea   : > { %530 = vrot.lane.b32.xlu1 %v2834_v13, %s2709_s28 }
  0xeb   : > { %883 = vrot.lane.b32.xlu0 %v2834_v13, %s2710_s30 }
  0xee   : > { %887 = vrot.lane.b32.xlu1 %v2839_v16, %s2710_s30  ;;  %s3099_s30 = scalar_lea.hbm %s3156_s6, %s2556_s19 }
  0xef   : > { %1085 = vrot.lane.b32.xlu0 %v2839_v16, %s2711_s8 }
  0xf2   : > { %1081 = vrot.lane.b32.xlu1 %v2834_v13, %s2711_s8 }
  0xf3   : > { %1268 = vrot.lane.b32.xlu0 %v2836_v15, %s2712_s11 }
  0xf6   : > { %1083 = vrot.lane.b32.xlu1 %v2836_v15, %s2711_s8  ;;  %s2628_s8 = scalar_lea.vmem %s3101_s20, 768 }
  0xf7   : > { %1266 = vrot.lane.b32.xlu0 %v2834_v13, %s2712_s11  ;;  %p2629_p12 = scmp.ne.s32.totalorder %s3101_s20, %s2628_s8 }
  0xf9   : > { %p2630_p13 = pnand %p2629_p12, %p2795_p4 }
  0xfa   : > { %1270 = vrot.lane.b32.xlu1 %v2839_v16, %s2712_s11  ;;  %s2717_s11 = smov [#allocation3]  }
  0xfb   : > { %1462 = vrot.lane.b32.xlu0 %v2839_v16, %s2713_s12  ;;  %p2631_p0 = pneg %p2630_p13 }
  0xfe   : > { %1458 = vrot.lane.b32.xlu1 %v2834_v13, %s2713_s12 }
  0xff   : > { %1660 = vrot.lane.b32.xlu0 %v2836_v15, %s2714_s13 }
 0x102   : > { %1460 = vrot.lane.b32.xlu1 %v2836_v15, %s2713_s12  ;;  %s2632_s12 = sshll.u32 %s2717_s11, 4  ;;  %s2633_s12 = int_to_ptr.vmem [resolvable:$false] %s2632_s12 }
 0x103   : > { %1658 = vrot.lane.b32.xlu0 %v2834_v13, %s2714_s13  ;;  %p2635_p1 = scmp.lt.s32.totalorder %s3101_s20, %s2633_s12 }
 0x106   : > { %1662 = vrot.lane.b32.xlu1 %v2839_v16, %s2714_s13  ;;  %s2634_s13 = scalar_lea.vmem %s2633_s12, 1536 }
 0x107   : > { %1860 = vrot.lane.b32.xlu0 %v2839_v16, %s2715_s14  ;;  %p2636_p2 = scmp.lt.s32.totalorder %s2634_s13, %s2628_s8 }
 0x109   : > { %p2637_p3 = por %p2636_p2, %p2635_p1 }
 0x10a   : > { %1856 = vrot.lane.b32.xlu1 %v2834_v13, %s2715_s14 }
 0x10b   : > { %2057 = vrot.lane.b32.xlu0 %v2836_v15, %s2716_s15  ;;  %p2638_p5 = pnand %p2637_p3, %p2631_p0 }
 0x10e   : > { %1858 = vrot.lane.b32.xlu1 %v2836_v15, %s2715_s14 }
 0x10f   : > { %2055 = vrot.lane.b32.xlu0 %v2834_v13, %s2716_s15 }
 0x112   : > { %2059 = vrot.lane.b32.xlu1 %v2839_v16, %s2716_s15 }
 0x113   : > { %2246 = vperm.xlu0 %2625, %v2238_v17  }
 0x116   : > { %2241 = vperm.xlu1 %2626, %v2237_v18  }
 0x155   : > { %v533_v32 = vpop.permute.xlu0 %532 }
 0x158   : > { %v535_v35 = vpop.permute.xlu1 %534 }
 0x159   : > { %2509 = vmatprep.subr.msk.mxu1 %vm526_vm10, %v535_v35  ;;  %v538_v38 = vsel %vm536_vm11, %v533_v32, %v535_v35  ;;  %v886_v39 = vpop.permute.xlu0 %885 }
 0x15a   : > { %2510 = vmatpush3.msk.msra.mxu1 %vm526_vm10, %v535_v35  ;;  %2398 = vmatprep.subr.msk.mxu0 %vm525_vm12, %v538_v38  ;;  %vm1079_vm10 = vcmp.eq.s32.totalorder %v1073_v54, 1  ;;  %vm1640_vm12 = vcmp.lt.s32.totalorder %v2873_v20, 15  ;;  %v2437_v35 = vld [vmem:[%s3154_s4 + $0x58] sm:$0xff]  ;;  %v2445_v20 = vld [vmem:[%s3154_s4 + $0x60] sm:$0xff] }
 0x15b   : > { %2405 = vmatprep.subr.msk.mxu1 %vm504_vm13, %v2836_v15  ;;  %2512 = vmatmul.mubr.msk.f32.vlgmr.msra.gmra.mxu1 %vm548_vm3, %v2397_v36  ;;  %vm1272_vm13 = vcmask 891904   ;;  %v2431_v15 = vld [vmem:[%s3154_s4 + $0x48] sm:$0xff] }
 0x15c   : > { %v531_v42 = vpop.permute.xlu1 %530  ;;  %2406 = vmatpush1.msk.msra.mxu1 %vm503_vm14, %v2834_v13  ;;  %777 = vmatprep.mubr.f32.mxu1 %v2706_v0  ;;  %vm1641_vm14 = vmand %vm1640_vm12, %vm488_vm6  ;;  %vm1464_vm6 = vcmask 883712  }
 0x15d   : > { %v537_v43 = vsel %vm536_vm11, %v531_v42, %v533_v32  ;;  %v884_v45 = vpop.permute.xlu0 %883  ;;  %vm1078_vm11 = vcmp.eq.s32.totalorder %v1069_v56, 1  ;;  %v1642_v12 = vsel %vm1641_vm14, 1, %v2708_v2  ;;  %v1840_v32 = vsel %vm1640_vm12, 1, %v2708_v2  ;;  %v2446_v42 = vld [vmem:[%s3154_s4 + $0x68] sm:$0xff] }
 0x15e   : > { %2399 = vmatpush1.msk.msra.mxu0 %vm524_vm15, %v537_v43  ;;  %v890_v60 = vsel %vm889_vm4, %v884_v45, %v886_v39  ;;  %vm2990_vm15 = vcmp.eq.s32.totalorder %v1454_v10, 1  ;;  %v1654_v18 = vrot.slane %v1642_v12, %v2882_v23  ;;  %v1650_v22 = vrot.slane %v1642_v12, %v2887_v25 }
 0x15f   : > { %2400 = vmatmul.mubr.msk.f32.vlgmr.msra.gmra.mxu0 %vm548_vm3, %v2830_v8  ;;  %2514 = vmatprep.subr.msk.mxu0 %vm505_vm0, %v2839_v16  ;;  %v1852_v21 = vrot.slane %v1840_v32, %v2882_v23  ;;  %v1848_v37 = vrot.slane %v1840_v32, %v2887_v25  ;;  %v1844_v41 = vrot.slane %v1840_v32, %v2890_v27 }
 0x160   : > { %v888_v47 = vpop.permute.xlu1 %887  ;;  %2407 = vmatmul.mubr.msk.f32.vlgmr.msra.gmra.mxu1 %vm548_vm3, %v509_v44  ;;  %2515 = vmatpush3.msk.msra.mxu0 %vm505_vm0, %v2839_v16  ;;  %vm1456_vm0 = vcmp.eq.s32.totalorder %v1450_v11, 1 }
 0x161   : > { %v891_v48 = vsel %vm889_vm4, %v886_v39, %v888_v47  ;;  %2519 = vmatprep.subr.msk.mxu1 %vm882_vm1, %v888_v47  ;;  %625 = vmatprep.mubr.f32.mxu0 %v2706_v0  ;;  %v1086_v50 = vpop.permute.xlu0 %1085  ;;  %vm1656_vm4 = vcmp.eq.s32.totalorder %v1650_v22, 1 }
 0x162   : > { %2520 = vmatpush3.msk.msra.mxu1 %vm882_vm1, %v888_v47  ;;  %2414 = vmatprep.subr.msk.mxu0 %vm881_vm2, %v891_v48  ;;  %vm1455_vm1 = vcmp.eq.s32.totalorder %v1446_v14, 1  ;;  %vm3006_vm2 = vcmp.eq.s32.totalorder %v1654_v18, 1 }
 0x163   : > { %2401 = vmatmul.mubr.msk.f32.gmra.mxu0 %vm548_vm3, %v2397_v36  ;;  %783 = vmatprep.mubr.f32.mxu1 %v2706_v0  ;;  %v1646_v36 = vrot.slane %v1642_v12, %v2890_v27 }
 0x164   : > { %v1082_v55 = vpop.permute.xlu1 %1081  ;;  %2408 = vmatmul.mubr.msk.f32.gmra.mxu1 %vm548_vm3, %v510_v49  ;;  %2516 = vmatprep.mubr.msk.f32.mxu0 %vm548_vm3, %v509_v44 }
 0x165   : > { %2521 = vmatprep.mubr.msk.f32.mxu1 %vm548_vm3, %v2412_v52  ;;  %v1269_v58 = vpop.permute.xlu0 %1268 }
 0x167   : > { %2517 = vmatmul.mubr.msk.f32.vlgmr.msra.gmra.mxu0 %vm548_vm3, %v510_v49 }
 0x168   : > { %v1084_v61 = vpop.permute.xlu1 %1083  ;;  %2415 = vmatpush1.msk.msra.mxu0 %vm880_vm5, %v890_v60  ;;  %2522 = vmatmul.mubr.msk.f32.vlgmr.msra.gmra.mxu1 %vm548_vm3, %v2413_v57  ;;  %vm1664_vm5 = vcmask 752640  }
 0x169   : > { %v1088_v62 = vsel %vm1087_vm7, %v1082_v55, %v1084_v61  ;;  %2524 = vmatprep.subr.msk.mxu0 %vm2944_vm9, %v1086_v50  ;;  %v1089_v63 = vsel %vm1087_vm7, %v1084_v61, %v1086_v50  ;;  %971 = vmatprep.mubr.f32.mxu0 %v2706_v0  ;;  %v1267_v3 = vpop.permute.xlu0 %1266  ;;  %vm2038_vm7 = vmand %vm1640_vm12, %vm865_vm8  ;;  %vm1655_vm8 = vcmp.eq.s32.totalorder %v1646_v36, 1  ;;  %vm1853_vm12 = vcmp.eq.s32.totalorder %v1844_v41, 1 }
 0x16a   : > { %2423 = vmatprep.subr.msk.mxu1 %vm1079_vm10, %v1089_v63  ;;  %1169 = vmatprep.mubr.f32.mxu1 %v2706_v0  ;;  %v1273_v19 = vsel %vm1272_vm13, %v1267_v3, %v1269_v58  ;;  %v2039_v38 = vsel %vm2038_vm7, 1, %v2708_v2  ;;  %vm3046_vm10 = vcmp.eq.s32.totalorder %v1852_v21, 1 }
 0x16b   : > { %2424 = vmatpush1.msk.msra.mxu1 %vm1078_vm11, %v1088_v62  ;;  %2416 = vmatmul.mubr.msk.f32.vlgmr.msra.gmra.mxu0 %vm548_vm3, %v2412_v52  ;;  %v2051_v2 = vrot.slane %v2039_v38, %v2882_v23  ;;  %vm1854_vm11 = vcmp.eq.s32.totalorder %v1848_v37, 1  ;;  %v2047_v45 = vrot.slane %v2039_v38, %v2887_v25  ;;  %v2454_v23 = vld [vmem:[%s3154_s4 + $0x70] sm:$0xff]  ;;  %v2043_v52 = vrot.slane %v2039_v38, %v2890_v27  ;;  %v2464_v27 = vld [vmem:[%s3154_s4 + $0x88] sm:$0xff] }
 0x16c   : > { %v1271_v5 = vpop.permute.xlu1 %1270  ;;  %2525 = vmatpush3.msk.msra.mxu0 %vm2944_vm9, %v1086_v50  ;;  %2425 = vmatmul.mubr.msk.f32.vlgmr.msra.gmra.mxu1 %vm548_vm3, %v2421_v1  ;;  %vm1862_vm9 = vcmask 744448  }
 0x16d   : > { %2529 = vmatprep.subr.mxu1 %v1271_v5  ;;  %v1274_v6 = vsel %vm1272_vm13, %v1269_v58, %v1271_v5  ;;  %977 = vmatprep.mubr.f32.mxu0 %v2706_v0  ;;  %v1463_v8 = vpop.permute.xlu0 %1462  ;;  %vm2054_vm13 = vcmp.eq.s32.totalorder %v2051_v2, 1  ;;  %vm2053_vm14 = vcmp.eq.s32.totalorder %v2047_v45, 1 }
 0x16e   : > { %2530 = vmatpush3.msra.mxu1 %v1271_v5  ;;  %1314 = vmatprep.subr.mxu0 %v1274_v6 }
 0x16f   : > { %2417 = vmatmul.mubr.msk.f32.gmra.mxu0 %vm548_vm3, %v2413_v57  ;;  %1175 = vmatprep.mubr.f32.mxu1 %v2706_v0 }
 0x170   : > { %v1459_v13 = vpop.permute.xlu1 %1458  ;;  %2426 = vmatmul.mubr.msk.f32.gmra.mxu1 %vm548_vm3, %v2422_v7  ;;  %2526 = vmatprep.mubr.msk.f32.mxu0 %vm548_vm3, %v2421_v1 }
 0x171   : > { %2531 = vmatprep.mubr.msk.f32.mxu1 %vm548_vm3, %v2430_v9  ;;  %v1661_v16 = vpop.permute.xlu0 %1660 }
 0x173   : > { %2527 = vmatmul.mubr.msk.f32.vlgmr.msra.gmra.mxu0 %vm548_vm3, %v2422_v7 }
 0x174   : > { %v1461_v24 = vpop.permute.xlu1 %1460  ;;  %1315 = vmatpush1.msra.mxu0 %v1273_v19  ;;  %2532 = vmatmul.mubr.msk.f32.vlgmr.msra.gmra.mxu1 %vm548_vm3, %v2431_v15 }
 0x175   : > { %v1465_v26 = vsel %vm1464_vm6, %v1459_v13, %v1461_v24  ;;  %2534 = vmatprep.subr.msk.mxu0 %vm2990_vm15, %v1463_v8  ;;  %v1466_v28 = vsel %vm1464_vm6, %v1461_v24, %v1463_v8  ;;  %1348 = vmatprep.mubr.f32.mxu0 %v2706_v0  ;;  %v1659_v31 = vpop.permute.xlu0 %1658  ;;  %vm2061_vm6 = vcmask 736256  }
 0x176   : > { %2438 = vmatprep.subr.msk.mxu1 %vm1456_vm0, %v1466_v28  ;;  %1546 = vmatprep.mubr.f32.mxu1 %v2706_v0  ;;  %v1665_v44 = vsel %vm1664_vm5, %v1659_v31, %v1661_v16 }
 0x177   : > { %2439 = vmatpush1.msk.msra.mxu1 %vm1455_vm1, %v1465_v26  ;;  %2432 = vmatmul.mubr.msk.f32.vlgmr.msra.gmra.mxu0 %vm548_vm3, %v2430_v9 }
 0x178   : > { %v1663_v33 = vpop.permute.xlu1 %1662  ;;  %2535 = vmatpush3.msk.msra.mxu0 %vm2990_vm15, %v1463_v8  ;;  %2440 = vmatmul.mubr.msk.f32.vlgmr.msra.gmra.mxu1 %vm548_vm3, %v2436_v29  ;;  %vm2052_vm15 = vcmp.eq.s32.totalorder %v2043_v52, 1 }
 0x179   : > { %v1666_v34 = vsel %vm1664_vm5, %v1661_v16, %v1663_v33  ;;  %2539 = vmatprep.subr.msk.mxu1 %vm3006_vm2, %v1663_v33  ;;  %1354 = vmatprep.mubr.f32.mxu0 %v2706_v0  ;;  %v1861_v40 = vpop.permute.xlu0 %1860 }
 0x17a   : > { %2540 = vmatpush3.msk.msra.mxu1 %vm3006_vm2, %v1663_v33  ;;  %2447 = vmatprep.subr.msk.mxu0 %vm1656_vm4, %v1666_v34 }
 0x17b   : > { %2433 = vmatmul.mubr.msk.f32.gmra.mxu0 %vm548_vm3, %v2431_v15  ;;  %1552 = vmatprep.mubr.f32.mxu1 %v2706_v0 }
 0x17c   : > { %v1857_v39 = vpop.permute.xlu1 %1856  ;;  %2441 = vmatmul.mubr.msk.f32.gmra.mxu1 %vm548_vm3, %v2437_v35  ;;  %2536 = vmatprep.mubr.msk.f32.mxu0 %vm548_vm3, %v2436_v29 }
 0x17d   : > { %2541 = vmatprep.mubr.msk.f32.mxu1 %vm548_vm3, %v2445_v20  ;;  %v2058_v49 = vpop.permute.xlu0 %2057 }
 0x17f   : > { %2537 = vmatmul.mubr.msk.f32.vlgmr.msra.gmra.mxu0 %vm548_vm3, %v2437_v35 }
 0x180   : > { %v1859_v46 = vpop.permute.xlu1 %1858  ;;  %2448 = vmatpush1.msk.msra.mxu0 %vm1655_vm8, %v1665_v44  ;;  %2542 = vmatmul.mubr.msk.f32.vlgmr.msra.gmra.mxu1 %vm548_vm3, %v2446_v42 }
 0x181   : > { %v1863_v47 = vsel %vm1862_vm9, %v1857_v39, %v1859_v46  ;;  %2544 = vmatprep.subr.msk.mxu0 %vm3046_vm10, %v1861_v40  ;;  %v1864_v48 = vsel %vm1862_vm9, %v1859_v46, %v1861_v40  ;;  %1746 = vmatprep.mubr.f32.mxu0 %v2706_v0  ;;  %v2056_v54 = vpop.permute.xlu0 %2055 }
 0x182   : > { %2456 = vmatprep.subr.msk.mxu1 %vm1854_vm11, %v1864_v48  ;;  %1944 = vmatprep.mubr.f32.mxu1 %v2706_v0  ;;  %v2062_v55 = vsel %vm2061_vm6, %v2056_v54, %v2058_v49 }
 0x183   : > { %2457 = vmatpush1.msk.msra.mxu1 %vm1853_vm12, %v1863_v47  ;;  %2449 = vmatmul.mubr.msk.f32.vlgmr.msra.gmra.mxu0 %vm548_vm3, %v2445_v20 }
 0x184   : > { %v2060_v25 = vpop.permute.xlu1 %2059  ;;  %2545 = vmatpush3.msk.msra.mxu0 %vm3046_vm10, %v1861_v40  ;;  %2458 = vmatmul.mubr.msk.f32.vlgmr.msra.gmra.mxu1 %vm548_vm3, %v2454_v23 }
 0x185   : > { %v2063_v50 = vsel %vm2061_vm6, %v2058_v49, %v2060_v25  ;;  %2549 = vmatprep.subr.msk.mxu1 %vm2054_vm13, %v2060_v25  ;;  %1752 = vmatprep.mubr.f32.mxu0 %v2706_v0 }
 0x186   : > { %2550 = vmatpush3.msk.msra.mxu1 %vm2054_vm13, %v2060_v25  ;;  %2465 = vmatprep.subr.msk.mxu0 %vm2053_vm14, %v2063_v50 }
 0x187   : > { %2450 = vmatmul.mubr.msk.f32.gmra.mxu0 %vm548_vm3, %v2446_v42  ;;  %1950 = vmatprep.mubr.f32.mxu1 %v2706_v0 }
 0x188   : > { %2459 = vmatmul.mubr.msk.f32.gmra.mxu1 %vm548_vm3, %v2455_v51  ;;  %2546 = vmatprep.mubr.msk.f32.mxu0 %vm548_vm3, %v2454_v23 }
 0x189   : > { %2551 = vmatprep.mubr.msk.f32.mxu1 %vm548_vm3, %v2463_v53 }
 0x18b   : > { %2547 = vmatmul.mubr.msk.f32.vlgmr.msra.gmra.mxu0 %vm548_vm3, %v2455_v51 }
 0x18c   : > { %2466 = vmatpush1.msk.msra.mxu0 %vm2052_vm15, %v2062_v55  ;;  %2552 = vmatmul.mubr.msk.f32.vlgmr.msra.gmra.mxu1 %vm548_vm3, %v2464_v27 }
 0x18d   : > { %2143 = vmatprep.mubr.f32.mxu0 %v2706_v0 }
 0x18f   : > { %2467 = vmatmul.mubr.msk.f32.vlgmr.msra.gmra.mxu0 %vm548_vm3, %v2463_v53 }
 0x190   : > { %2149 = vmatprep.mubr.f32.mxu0 %v2706_v0 }
 0x193   : > { %2468 = vmatmul.mubr.msk.f32.gmra.mxu0 %vm548_vm3, %v2464_v27  ;;  %vm2257_vm3 = vcmask 244736  }
 0x21b   : > { %v2513_v56 = vpop.f32.mrf.mxu1 }
 0x21d   : > { %v698_v57 = vpop.f32.mrf.mxu1 }
 0x21f   : > { %v621_v58 = vpop.f32.mrf.mxu0 }
 0x220   : > { %v779_v59 = vpop.f32.mrf.mxu1 }
 0x221   : > { %v623_v60 = vpop.f32.mrf.mxu0  ;;  %v780_v30 = vadd.f32 %v779_v59, %v621_v58 }
 0x222   : > { %v781_v61 = vpop.f32.mrf.mxu1 }
 0x223   : > { %v627_v62 = vpop.f32.mrf.mxu0  ;;  %v782_v33 = vadd.f32 %v781_v61, %v623_v60 }
 0x224   : > { %v785_v63 = vpop.f32.mrf.mxu1 }
 0x225   : > { %v629_v1 = vpop.f32.mrf.mxu0  ;;  %v786_v38 = vadd.f32 %v785_v63, %v627_v62 }
 0x226   : > { %v787_v3 = vpop.f32.mrf.mxu1 }
 0x227   : > { %v2518_v4 = vpop.f32.mrf.mxu0  ;;  %v788_v42 = vadd.f32 %v787_v3, %v629_v1 }
 0x228   : > { %v2523_v5 = vpop.f32.mrf.mxu1  ;;  %v862_v26 = vadd.f32 %v2518_v4, %v2513_v56 }
 0x229   : > { %v856_v6 = vpop.f32.mrf.mxu0 }
 0x22a   : > { %v1050_v7 = vpop.f32.mrf.mxu1  ;;  %v857_v31 = vadd.f32 %v856_v6, %v698_v57  ;;  %v1064_v35 = vadd.f32 %v2523_v5, %v862_v26 }
 0x22b   : > { %v973_v8 = vpop.f32.mrf.mxu0 }
 0x22c   : > { %v1171_v9 = vpop.f32.mrf.mxu1  ;;  %v1059_v36 = vadd.f32 %v973_v8, %v780_v30  ;;  %v1061_v39 = vadd.f32 %v1050_v7, %v857_v31 }
 0x22d   : > { %v975_v10 = vpop.f32.mrf.mxu0 }
 0x22e   : > { %v1173_v0 = vpop.f32.mrf.mxu1  ;;  %v1060_v21 = vadd.f32 %v975_v10, %v782_v33  ;;  %v1257_v2 = vadd.f32 %v1171_v9, %v1059_v36 }
 0x22f   : > { %v979_v11 = vpop.f32.mrf.mxu0 }
 0x230   : > { %v1177_v12 = vpop.f32.mrf.mxu1  ;;  %v1062_v44 = vadd.f32 %v979_v11, %v786_v38  ;;  %v1258_v47 = vadd.f32 %v1173_v0, %v1060_v21 }
 0x231   : > { %v981_v13 = vpop.f32.mrf.mxu0 }
 0x232   : > { %v1179_v14 = vpop.f32.mrf.mxu1  ;;  %v1063_v48 = vadd.f32 %v981_v13, %v788_v42  ;;  %v1260_v53 = vadd.f32 %v1177_v12, %v1062_v44  ;;  %v2247_v13 = vpop.permute.xlu0 %2246 }
 0x233   : > { %v2528_v15 = vpop.f32.mrf.mxu0 }
 0x234   : > { %v2533_v16 = vpop.f32.mrf.mxu1  ;;  %v1262_v40 = vadd.f32 %v2528_v15, %v1064_v35  ;;  %v1261_v56 = vadd.f32 %v1179_v14, %v1063_v48 }
 0x235   : > { %v1248_v17 = vpop.f32.mrf.mxu0 }
 0x236   : > { %v1427_v18 = vpop.f32.mrf.mxu1  ;;  %v1259_v45 = vadd.f32 %v1248_v17, %v1061_v39  ;;  %v1441_v49 = vadd.f32 %v2533_v16, %v1262_v40 }
 0x237   : > { %v1350_v19 = vpop.f32.mrf.mxu0 }
 0x238   : > { %v1548_v22 = vpop.f32.mrf.mxu1  ;;  %v1436_v25 = vadd.f32 %v1350_v19, %v1257_v2  ;;  %v1438_v54 = vadd.f32 %v1427_v18, %v1259_v45 }
 0x239   : > { %v1352_v24 = vpop.f32.mrf.mxu0 }
 0x23a   : > { %v1550_v28 = vpop.f32.mrf.mxu1  ;;  %v1437_v51 = vadd.f32 %v1352_v24, %v1258_v47  ;;  %v1634_v58 = vadd.f32 %v1548_v22, %v1436_v25  ;;  %v2242_v24 = vpop.permute.xlu1 %2241 }
 0x23b   : > { %v1356_v29 = vpop.f32.mrf.mxu0 }
 0x23c   : > { %v1554_v32 = vpop.f32.mrf.mxu1  ;;  %v1439_v59 = vadd.f32 %v1356_v29, %v1260_v53  ;;  %v1635_v62 = vadd.f32 %v1550_v28, %v1437_v51 }
 0x23d   : > { %v1358_v34 = vpop.f32.mrf.mxu0 }
 0x23e   : > { %v1556_v20 = vpop.f32.mrf.mxu1  ;;  %v1440_v63 = vadd.f32 %v1358_v34, %v1261_v56  ;;  %v1637_v8 = vadd.f32 %v1554_v32, %v1439_v59 }
 0x23f   : > { %v2538_v37 = vpop.f32.mrf.mxu0 }
 0x240   : > { %v2543_v41 = vpop.f32.mrf.mxu1  ;;  %v1639_v27 = vadd.f32 %v2538_v37, %v1441_v49  ;;  %v1638_v11 = vadd.f32 %v1556_v20, %v1440_v63 }
 0x241   : > { %v1625_v43 = vpop.f32.mrf.mxu0 }
 0x242   : > { %v1825_v46 = vpop.f32.mrf.mxu1  ;;  %v1636_v60 = vadd.f32 %v1625_v43, %v1438_v54  ;;  %v1839_v3 = vadd.f32 %v2543_v41, %v1639_v27 }
 0x243   : > { %v1748_v23 = vpop.f32.mrf.mxu0 }
 0x244   : > { %v1946_v50 = vpop.f32.mrf.mxu1  ;;  %v1834_v4 = vadd.f32 %v1748_v23, %v1634_v58  ;;  %v1836_v9 = vadd.f32 %v1825_v46, %v1636_v60 }
 0x245   : > { %v1750_v52 = vpop.f32.mrf.mxu0 }
 0x246   : > { %v1948_v55 = vpop.f32.mrf.mxu1  ;;  %v1835_v6 = vadd.f32 %v1750_v52, %v1635_v62  ;;  %v2032_v14 = vadd.f32 %v1946_v50, %v1834_v4 }
 0x247   : > { %v1754_v57 = vpop.f32.mrf.mxu0 }
 0x248   : > { %v1952_v61 = vpop.f32.mrf.mxu1  ;;  %v1837_v15 = vadd.f32 %v1754_v57, %v1637_v8  ;;  %v2033_v19 = vadd.f32 %v1948_v55, %v1835_v6 }
 0x249   : > { %v1756_v1 = vpop.f32.mrf.mxu0 }
 0x24a   : > { %v1954_v5 = vpop.f32.mrf.mxu1  ;;  %v1838_v26 = vadd.f32 %v1756_v1, %v1638_v11  ;;  %v2035_v32 = vadd.f32 %v1952_v61, %v1837_v15 }
 0x24b   : > { %v2548_v7 = vpop.f32.mrf.mxu0 }
 0x24c   : > { %v2037_v10 = vadd.f32 %v2548_v7, %v1839_v3  ;;  %v2553_v0 = vpop.f32.mrf.mxu1  ;;  %v2036_v20 = vadd.f32 %v1954_v5, %v1838_v26 }
 0x24d   : > { %v2023_v12 = vpop.f32.mrf.mxu0 }
 0x24e   : > { %v2034_v16 = vadd.f32 %v2023_v12, %v1836_v9  ;;  %v2236_v17 = vadd.f32 %v2553_v0, %v2037_v10  ;;  %v2222_v18 = vpop.f32.mrf.mxu1 }
 0x24f   : > { %v2145_v22 = vpop.f32.mrf.mxu0 }
 0x250   : > { %v2254_v28 = vadd.f32 %v2247_v13, %v2236_v17  ;;  %v2231_v29 = vadd.f32 %v2145_v22, %v2032_v14  ;;  %v2233_v30 = vadd.f32 %v2222_v18, %v2034_v16 }
 0x251   : > { %v2147_v31 = vpop.f32.mrf.mxu0 }
 0x252   : > { %2261 = vst.msk [vmem:[%s290_s18 + $0x28] sm:$0xff] %vm2257_vm3, %v2254_v28  ;;  %v2232_v33 = vadd.f32 %v2147_v31, %v2033_v19  ;;  %v2249_v34 = vadd.f32 %v2242_v24, %v2231_v29  ;;  %v2251_v35 = vadd.f32 %v2242_v24, %v2233_v30 }
 0x253   : > { %v2151_v36 = vpop.f32.mrf.mxu0 }
 0x254   : > { %v2250_v21 = vadd.f32 %v2242_v24, %v2232_v33  ;;  %2255 = vst [vmem:[%s290_s18] sm:$0xff] %v2249_v34  ;;  %2258 = vst.msk [vmem:[%s290_s18 + $0x10] sm:$0xff] %vm2257_vm3, %v2251_v35  ;;  %v2234_v37 = vadd.f32 %v2151_v36, %v2035_v32 }
 0x255   : > { %v2153_v38 = vpop.f32.mrf.mxu0 }
 0x256   : > { %2256 = vst [vmem:[%s290_s18 + $0x8] sm:$0xff] %v2250_v21  ;;  %v2252_v39 = vadd.f32 %v2247_v13, %v2234_v37  ;;  %v2235_v40 = vadd.f32 %v2153_v38, %v2036_v20 }
 0x258   : > { %2259 = vst [vmem:[%s290_s18 + $0x18] sm:$0xff] %v2252_v39  ;;  %v2253_v41 = vadd.f32 %v2247_v13, %v2235_v40 }
 0x25a   : > { %2260 = vst [vmem:[%s290_s18 + $0x20] sm:$0xff] %v2253_v41 }
 0x25b   : > { %2641 = shalt.err (!%p2638_p5)
}
 0x25c   : > { %s2642_s14 = scalar_lea.hbm %s3099_s30, 768  ;;  %s2646_s17 = scalar_lea.hbm %s3156_s6, 1536 }
 0x25d   : > { %p2643_p6 = scmp.ne.s32.totalorder %s3099_s30, %s2642_s14  ;;  %p2647_p10 = scmp.lt.s32.totalorder %s3099_s30, %s3156_s6 }
 0x25e   : > { %p2648_p11 = scmp.lt.s32.totalorder %s2646_s17, %s2642_s14 }
 0x25f   : > { %p2644_p7 = pnand %p2643_p6, %p2795_p4 }
 0x260   : > { %p2649_p12 = por %p2648_p11, %p2647_p10 }
 0x261   : > { %p2645_p9 = pneg %p2644_p7 }
 0x263   : > { %p2650_p13 = pnand %p2649_p12, %p2645_p9 }
 0x265   : > { %2653 = shalt.err (!%p2650_p13)
}
 0x266   : > { %s2718_s27 = smov 384   ;;  %s2719_s28 = smov 24  }
 0x267   : > { %2557 = dma.vmem_to_hbm [thread:$0]  (%p2795_p4), %s3101_s20, 768, %s3099_s30, %s3105_s24, %s2718_s27, %s2718_s27, %s2719_s28  }
 0x268 PF: > { %p2563_p0 = scmp.ge.s32.totalorder %s2704_s26, 2  ;;  %s2294_s8 = sand.u32 1, %s2684_s21  }
 0x269   : > { %s2295_s11 = scalar_lea.sflag [#allocation4], %s2294_s8 }
 0x26a   : > { %p2560_p1 = pnand %p2563_p0, %p2802_p8 }
 0x26c   : > { %p2561_p2 = pneg %p2560_p1 }
 0x26e   : > { %2679 = dma.done.wait (%p2561_p2), %s2295_s11, 768  }
 0x26f   : > { %2681 = vsyncadd (%p2561_p2), %s2295_s11, 4294966528  ;;  %s19_s26 = sadd.s32 1, %s2704_s26   ;;  %s3167_s21 = smov %s2688_s22 }
 0x270   : > { %p16_p3 = scmp.ge.s32.totalorder %s19_s26, 4   ;;  %s3168_s22 = smov %s2692_s23 }
 0x271   : > { %s3169_s23 = smov %s2808_s10  ;;  %s3170_s24 = smov %s2700_s25 }
 0x272   : > { %s3171_s25 = smov %s3173_s29  ;;  %18 = sbr.rel (!%p16_p3) target bundleno = 4 (0x4), region = 98 }
 0x277   :  { %2300 = vsyncpa [#allocation4], 1 }
 0x278   :  { %2302 = vsyncpa [#allocation4 + $0x1], 1 }

</bundles_post_ra>
